<compile_context>
chip_gen: v5e
topology: v5e:2x2
jax: 0.10.0
libtpu: 0.0.40
codegen_flags: <defaults>
</compile_context>

<pallas_src>
import jax
import jax.numpy as jnp
from jax.experimental import pallas as pl
from jax.experimental.pallas import tpu as pltpu


def _linear_kernel(x_ref, w_ref, b_ref, o_ref):
    # x_ref: (K, TB)  f32 VMEM  -- batch on the 128-lane axis
    # w_ref: (1, K)   f32 SMEM  -- PyTorch (out_features, in_features) layout
    # b_ref: (1,)     f32 SMEM
    # o_ref: (1, TB)  f32 VMEM  -- lane-dense output
    k_dim = x_ref.shape[0]  # K = 10, static

    # Start the accumulator at the bias (scalar broadcast from SMEM).
    acc = jnp.full(o_ref.shape, b_ref[0], dtype=jnp.float32)

    # Unrolled K=10 contraction on the VPU: scalar (SMEM) * vector (VMEM row).
    for k in range(k_dim):
        acc = acc + w_ref[0, k] * x_ref[k:k + 1, :]

    o_ref[...] = acc.astype(o_ref.dtype)


def linear_pallas(x, weight, bias, *, max_tb=2048):
    """x: (B, K) f32, weight: (N, K) f32 (PyTorch layout), bias: (N,) f32."""
    B, K = x.shape
    N, K2 = weight.shape
    assert K == K2 and N == 1 and bias.shape == (N,)

    # Layout plumbing only: put batch on the lane axis for the kernel.
    x_t = x.T  # (K, B)

    # Large lane-dense batch tiles; TB is either the full batch or a multiple
    # of 128 (satisfies the (8,128) block constraint on the lane axis).
    TB = B if B <= max_tb else max_tb
    grid = (pl.cdiv(B, TB),)

    out = pl.pallas_call(
        _linear_kernel,
        out_shape=jax.ShapeDtypeStruct((N, B), x.dtype),
        grid=grid,
        in_specs=[
            # x: batch-tiled, lane-dense.
            pl.BlockSpec((K, TB), lambda i: (0, i)),
            # weight: whole (1, K) array resident in SMEM for all grid steps.
            pl.BlockSpec(memory_space=pltpu.MemorySpace.SMEM),
            # bias: (1,) scalar in SMEM.
            pl.BlockSpec(memory_space=pltpu.MemorySpace.SMEM),
        ],
        out_specs=pl.BlockSpec((N, TB), lambda i: (0, i)),
        compiler_params=pltpu.CompilerParams(
            dimension_semantics=("parallel",),  # lets v7x shard batch over 2 TCs
        ),
    )(x_t, weight, bias)

    # (1, B) -> (B, 1); trivial since the leading dim is 1.
    return out.T


if __name__ == "__main__":
    key = jax.random.PRNGKey(0)
    k_x, k_w, k_b = jax.random.split(key, 3)

    B, K, N = 8, 10, 1  # batch=8, in_features=10, out_features=1

    x = jax.random.normal(k_x, (B, K), dtype=jnp.float32)
    # Mimic nn.Linear's uniform(-1/sqrt(K), 1/sqrt(K)) init, deterministically.
    bound = 1.0 / (K ** 0.5)
    weight = jax.random.uniform(k_w, (N, K), minval=-bound, maxval=bound,
                                dtype=jnp.float32)
    bias = jax.random.uniform(k_b, (N,), minval=-bound, maxval=bound,
                              dtype=jnp.float32)

    out = linear_pallas(x, weight, bias)
    out = jax.block_until_ready(out)

    # Cross-check against plain JAX reference (same semantics as nn.Linear).
    ref = x @ weight.T + bias
    assert out.shape == (B, N)
    assert jnp.allclose(out, ref, atol=1e-5, rtol=1e-5)

    print("KERNEL_OK")
</pallas_src>

<mosaic_0001>
module attributes {stable_mosaic.version = 11 : i64} {
  func.func @_linear_kernel(%arg0: i32, %arg1: memref<10x8xf32, #tpu.memory_space<vmem>>, %arg2: memref<1x10xf32, #tpu.memory_space<smem>>, %arg3: memref<1xf32, #tpu.memory_space<smem>>, %arg4: memref<1x8xf32, #tpu.memory_space<vmem>>) attributes {dimension_semantics = [#tpu.dimension_semantics<parallel>], iteration_bounds = array<i64: 1>, scalar_prefetch = 0 : i64, scratch_operands = 0 : i64, tpu.core_type = #tpu.core_type<tc>, window_params = [{transform_indices = @transform_0, window_bounds = array<i64: 10, 8>}, {transform_indices = @transform_1, window_bounds = array<i64: 1, 10>}, {transform_indices = @transform_2, window_bounds = array<i64: 1>}, {transform_indices = @transform_3, window_bounds = array<i64: 1, 8>}]} {
    %c0 = arith.constant 0 : index
    %0 = memref.load %arg3[%c0] : memref<1xf32, #tpu.memory_space<smem>>
    %1 = vector.broadcast %0 : f32 to vector<1x8xf32>
    %c0_0 = arith.constant 0 : index
    %c0_1 = arith.constant 0 : index
    %2 = memref.load %arg2[%c0_0, %c0_1] : memref<1x10xf32, #tpu.memory_space<smem>>
    %c0_2 = arith.constant 0 : index
    %c0_3 = arith.constant 0 : index
    %3 = vector.load %arg1[%c0_2, %c0_3] : memref<10x8xf32, #tpu.memory_space<vmem>>, vector<1x8xf32>
    %4 = vector.broadcast %2 : f32 to vector<1x8xf32>
    %5 = arith.mulf %4, %3 : vector<1x8xf32>
    %6 = arith.addf %1, %5 : vector<1x8xf32>
    %c0_4 = arith.constant 0 : index
    %c1 = arith.constant 1 : index
    %7 = memref.load %arg2[%c0_4, %c1] : memref<1x10xf32, #tpu.memory_space<smem>>
    %c1_5 = arith.constant 1 : index
    %c0_6 = arith.constant 0 : index
    %8 = vector.load %arg1[%c1_5, %c0_6] : memref<10x8xf32, #tpu.memory_space<vmem>>, vector<1x8xf32>
    %9 = vector.broadcast %7 : f32 to vector<1x8xf32>
    %10 = arith.mulf %9, %8 : vector<1x8xf32>
    %11 = arith.addf %6, %10 : vector<1x8xf32>
    %c0_7 = arith.constant 0 : index
    %c2 = arith.constant 2 : index
    %12 = memref.load %arg2[%c0_7, %c2] : memref<1x10xf32, #tpu.memory_space<smem>>
    %c2_8 = arith.constant 2 : index
    %c0_9 = arith.constant 0 : index
    %13 = vector.load %arg1[%c2_8, %c0_9] : memref<10x8xf32, #tpu.memory_space<vmem>>, vector<1x8xf32>
    %14 = vector.broadcast %12 : f32 to vector<1x8xf32>
    %15 = arith.mulf %14, %13 : vector<1x8xf32>
    %16 = arith.addf %11, %15 : vector<1x8xf32>
    %c0_10 = arith.constant 0 : index
    %c3 = arith.constant 3 : index
    %17 = memref.load %arg2[%c0_10, %c3] : memref<1x10xf32, #tpu.memory_space<smem>>
    %c3_11 = arith.constant 3 : index
    %c0_12 = arith.constant 0 : index
    %18 = vector.load %arg1[%c3_11, %c0_12] : memref<10x8xf32, #tpu.memory_space<vmem>>, vector<1x8xf32>
    %19 = vector.broadcast %17 : f32 to vector<1x8xf32>
    %20 = arith.mulf %19, %18 : vector<1x8xf32>
    %21 = arith.addf %16, %20 : vector<1x8xf32>
    %c0_13 = arith.constant 0 : index
    %c4 = arith.constant 4 : index
    %22 = memref.load %arg2[%c0_13, %c4] : memref<1x10xf32, #tpu.memory_space<smem>>
    %c4_14 = arith.constant 4 : index
    %c0_15 = arith.constant 0 : index
    %23 = vector.load %arg1[%c4_14, %c0_15] : memref<10x8xf32, #tpu.memory_space<vmem>>, vector<1x8xf32>
    %24 = vector.broadcast %22 : f32 to vector<1x8xf32>
    %25 = arith.mulf %24, %23 : vector<1x8xf32>
    %26 = arith.addf %21, %25 : vector<1x8xf32>
    %c0_16 = arith.constant 0 : index
    %c5 = arith.constant 5 : index
    %27 = memref.load %arg2[%c0_16, %c5] : memref<1x10xf32, #tpu.memory_space<smem>>
    %c5_17 = arith.constant 5 : index
    %c0_18 = arith.constant 0 : index
    %28 = vector.load %arg1[%c5_17, %c0_18] : memref<10x8xf32, #tpu.memory_space<vmem>>, vector<1x8xf32>
    %29 = vector.broadcast %27 : f32 to vector<1x8xf32>
    %30 = arith.mulf %29, %28 : vector<1x8xf32>
    %31 = arith.addf %26, %30 : vector<1x8xf32>
    %c0_19 = arith.constant 0 : index
    %c6 = arith.constant 6 : index
    %32 = memref.load %arg2[%c0_19, %c6] : memref<1x10xf32, #tpu.memory_space<smem>>
    %c6_20 = arith.constant 6 : index
    %c0_21 = arith.constant 0 : index
    %33 = vector.load %arg1[%c6_20, %c0_21] : memref<10x8xf32, #tpu.memory_space<vmem>>, vector<1x8xf32>
    %34 = vector.broadcast %32 : f32 to vector<1x8xf32>
    %35 = arith.mulf %34, %33 : vector<1x8xf32>
    %36 = arith.addf %31, %35 : vector<1x8xf32>
    %c0_22 = arith.constant 0 : index
    %c7 = arith.constant 7 : index
    %37 = memref.load %arg2[%c0_22, %c7] : memref<1x10xf32, #tpu.memory_space<smem>>
    %c7_23 = arith.constant 7 : index
    %c0_24 = arith.constant 0 : index
    %38 = vector.load %arg1[%c7_23, %c0_24] : memref<10x8xf32, #tpu.memory_space<vmem>>, vector<1x8xf32>
    %39 = vector.broadcast %37 : f32 to vector<1x8xf32>
    %40 = arith.mulf %39, %38 : vector<1x8xf32>
    %41 = arith.addf %36, %40 : vector<1x8xf32>
    %c0_25 = arith.constant 0 : index
    %c8 = arith.constant 8 : index
    %42 = memref.load %arg2[%c0_25, %c8] : memref<1x10xf32, #tpu.memory_space<smem>>
    %c8_26 = arith.constant 8 : index
    %c0_27 = arith.constant 0 : index
    %43 = vector.load %arg1[%c8_26, %c0_27] : memref<10x8xf32, #tpu.memory_space<vmem>>, vector<1x8xf32>
    %44 = vector.broadcast %42 : f32 to vector<1x8xf32>
    %45 = arith.mulf %44, %43 : vector<1x8xf32>
    %46 = arith.addf %41, %45 : vector<1x8xf32>
    %c0_28 = arith.constant 0 : index
    %c9 = arith.constant 9 : index
    %47 = memref.load %arg2[%c0_28, %c9] : memref<1x10xf32, #tpu.memory_space<smem>>
    %c9_29 = arith.constant 9 : index
    %c0_30 = arith.constant 0 : index
    %48 = vector.load %arg1[%c9_29, %c0_30] : memref<10x8xf32, #tpu.memory_space<vmem>>, vector<1x8xf32>
    %49 = vector.broadcast %47 : f32 to vector<1x8xf32>
    %50 = arith.mulf %49, %48 : vector<1x8xf32>
    %51 = arith.addf %46, %50 : vector<1x8xf32>
    %c0_31 = arith.constant 0 : index
    %c0_32 = arith.constant 0 : index
    %52 = vector.load %arg4[%c0_31, %c0_32] : memref<1x8xf32, #tpu.memory_space<vmem>>, vector<1x8xf32>
    tpu.vector_store %arg4[%c0_31, %c0_32], %51 {strides = array<i32>} : memref<1x8xf32, #tpu.memory_space<vmem>>, vector<1x8xf32>,
    return
  }
  func.func @transform_0(%arg0: i32) -> (i32, i32) {
    %c0_i32 = arith.constant 0 : i32
    %c0_i32_0 = arith.constant 0 : i32
    return %c0_i32, %arg0 : i32, i32
  }
  func.func @transform_1(%arg0: i32) -> (i32, i32) {
    %c0_i32 = arith.constant 0 : i32
    %c0_i32_0 = arith.constant 0 : i32
    %c0_i32_1 = arith.constant 0 : i32
    return %c0_i32, %c0_i32_0 : i32, i32
  }
  func.func @transform_2(%arg0: i32) -> i32 {
    %c0_i32 = arith.constant 0 : i32
    %c0_i32_0 = arith.constant 0 : i32
    return %c0_i32 : i32
  }
  func.func @transform_3(%arg0: i32) -> (i32, i32) {
    %c0_i32 = arith.constant 0 : i32
    %c0_i32_0 = arith.constant 0 : i32
    return %c0_i32, %arg0 : i32, i32
  }
}

</mosaic_0001>

<bundles_post_ra>
// kernel: tpu_custom_call.1
= control target key start
LH: loop header
LB: loop body
LE: loop exit
PB: predicated region body
PF: predicated region fallthrough
CT: control target
= control target key end

     0   :  { %9 = vsyncpa [#allocation5], 0  ;;  %s212_s0 = inlined_call_operand.vmem [shape: f32[10,8], index: 0, kind: input, shape index: {}]   ;;  %s213_s1 = inlined_call_operand.vmem [shape: f32[1,10], index: 1, kind: input, shape index: {}]   ;;  %s214_s2 = inlined_call_operand.<no memory space> [shape: f32[1], index: 2, kind: input, shape index: {}]   ;;  %s215_s3 = inlined_call_operand.hbm [shape: f32[1,8], index: 3, kind: output, shape index: {}]  }
   0x1   :  { %10 = vsyncpa [#allocation4], 0  ;;  %s18_s14 = sshll.u32 %s213_s1, 4  ;;  %s151_s15 = smov [#allocation3]   ;;  %s19_s14 = int_to_ptr.vmem [resolvable:$true] %s18_s14 }
   0x2   :  { %21 = dma.vmem_to_smem %s19_s14, 16, %s151_s15, [#allocation5]  }
   0x3   :  { %147 = dma.done.wait [#allocation5], 16  }
   0x4   :  { %148 = vsyncadd [#allocation5], 4294967280 }
   0x5   :  { %28 = sfence }
   0x6   :  { %s31_s16 = sld [smem:[#allocation3]]  ;;  %v32_v0 = vld [vmem:[%s212_s0] sm:$0x1]  ;;  %v37_v1 = vld [vmem:[%s212_s0 + $0x1] sm:$0x1]  ;;  %v30_v2 = vstv %s214_s2  ;;  %s90_s23 = sshll.u32 %s215_s3, 4  ;;  %s91_s23 = int_to_ptr.hbm [resolvable:$true] %s90_s23 }
   0x7   :  { %s100_s17 = sld [smem:[#allocation3 + $0x1]]  ;;  %v42_v4 = vld [vmem:[%s212_s0 + $0x2] sm:$0x1]  ;;  %v47_v9 = vld [vmem:[%s212_s0 + $0x3] sm:$0x1]  ;;  %vm81_vm0 = vcmask 57344  }
   0x8   :  { %s101_s18 = sld [smem:[#allocation3 + $0x2]]  ;;  %v52_v13 = vld [vmem:[%s212_s0 + $0x4] sm:$0x1]  ;;  %v57_v17 = vld [vmem:[%s212_s0 + $0x5] sm:$0x1] }
   0x9   :  { %s102_s19 = sld [smem:[#allocation3 + $0x3]]  ;;  %v62_v21 = vld [vmem:[%s212_s0 + $0x6] sm:$0x1]  ;;  %v67_v25 = vld [vmem:[%s212_s0 + $0x7] sm:$0x1] }
   0xa   :  { %s103_s22 = sld [smem:[#allocation3 + $0x4]]  ;;  %v72_v29 = vld [vmem:[%s212_s0 + $0x8] sm:$0x1]  ;;  %v77_v33 = vld [vmem:[%s212_s0 + $0x9] sm:$0x1] }
   0xb   :  { %s104_s1 = sld [smem:[#allocation3 + $0x5]] }
   0xc   :  { %v33_v3 = vstv %s31_s16  ;;  %s105_s29 = sld [smem:[#allocation3 + $0x6]] }
   0xd   :  { %v34_v5 = vmul.f32 %v33_v3, %v32_v0  ;;  %v38_v6 = vstv %s100_s17  ;;  %s106_s5 = sld [smem:[#allocation3 + $0x7]] }
   0xe   :  { %v39_v7 = vmul.f32 %v38_v6, %v37_v1  ;;  %v43_v8 = vstv %s101_s18  ;;  %s107_s7 = sld [smem:[#allocation3 + $0x8]] }
   0xf   :  { %v35_v10 = vadd.f32 %v34_v5, %v30_v2  ;;  %v44_v11 = vmul.f32 %v43_v8, %v42_v4  ;;  %v48_v12 = vstv %s102_s19  ;;  %s108_s10 = sld [smem:[#allocation3 + $0x9]]  ;;  %s152_s19 = smov [#allocation6]  }
  0x10   :  { %v53_v14 = vstv %s103_s22  ;;  %v49_v16 = vmul.f32 %v48_v12, %v47_v9  ;;  %s88_s20 = sshll.u32 %s152_s19, 4  ;;  %s89_s20 = int_to_ptr.vmem [resolvable:$true] %s88_s20 }
  0x11   :  { %v40_v15 = vadd.f32 %v39_v7, %v35_v10  ;;  %v58_v18 = vstv %s104_s1  ;;  %v54_v20 = vmul.f32 %v53_v14, %v52_v13 }
  0x12   :  { %v63_v22 = vstv %s105_s29  ;;  %v59_v24 = vmul.f32 %v58_v18, %v57_v17 }
  0x13   :  { %v45_v19 = vadd.f32 %v44_v11, %v40_v15  ;;  %v68_v26 = vstv %s106_s5  ;;  %v64_v28 = vmul.f32 %v63_v22, %v62_v21 }
  0x14   :  { %v73_v30 = vstv %s107_s7  ;;  %v69_v32 = vmul.f32 %v68_v26, %v67_v25 }
  0x15   :  { %v50_v23 = vadd.f32 %v49_v16, %v45_v19  ;;  %v78_v34 = vstv %s108_s10  ;;  %v74_v36 = vmul.f32 %v73_v30, %v72_v29 }
  0x16   :  { %v79_v38 = vmul.f32 %v78_v34, %v77_v33 }
  0x17   :  { %v55_v27 = vadd.f32 %v54_v20, %v50_v23 }
  0x19   :  { %v60_v31 = vadd.f32 %v59_v24, %v55_v27 }
  0x1b   :  { %v65_v35 = vadd.f32 %v64_v28, %v60_v31 }
  0x1d   :  { %v70_v37 = vadd.f32 %v69_v32, %v65_v35 }
  0x1f   :  { %v75_v39 = vadd.f32 %v74_v36, %v70_v37 }
  0x21   :  { %v80_v40 = vadd.f32 %v79_v38, %v75_v39 }
  0x23   :  { %82 = vst.msk [vmem:[#allocation6] sm:$0x1] %vm81_vm0, %v80_v40 }
  0x24   :  { %93 = dma.vmem_to_hbm [thread:$0]  %s89_s20, 16, %s91_s23, [#allocation4]  }
  0x25   :  { %149 = dma.done.wait [#allocation4], 16  }
  0x26   :  { %150 = vsyncadd [#allocation4], 4294967280 }
  0x27   :  { %98 = vsyncpa [#allocation4], 1 }
  0x28   :  { %99 = vsyncpa [#allocation5], 1 }

</bundles_post_ra>
